<compile_context>
chip_gen: v5e
topology: v5e:2x2
jax: 0.10.0
libtpu: 0.0.40
codegen_flags: <defaults>
</compile_context>

<pallas_src>
import jax
import jax.numpy as jnp
from jax.experimental import pallas as pl
from jax.experimental.pallas import tpu as pltpu


def _round_up(x, m):
    return ((x + m - 1) // m) * m


_NEG_BIG = -1.0e30  # baked into padded bias entries; exp() underflows to exactly 0


def _net_kernel(x_ref, w_ref, b_ref, o_ref):
    """One batch tile: logits = x @ W_t + b ; probs = softmax(logits, axis=-1)."""
    x = x_ref[...]                       # (TB, F)  f32, streamed
    w = w_ref[...]                       # (F, Op)  f32, resident (constant index_map)
    b = b_ref[...]                       # (1, Op)  f32, padded cols pre-set to -1e30

    # Linear layer on the MXU with f32 accumulation.  The padded-class mask is baked
    # into the bias (padded weight columns are zero), so no in-kernel iota/select.
    logits = jnp.dot(x, w, preferred_element_type=jnp.float32) + b

    # Numerically-stable softmax over classes, all in f32.  Exact division so each row
    # sums to 1 to f32 precision (review correctness concern).
    m = jnp.max(logits, axis=-1, keepdims=True)
    e = jnp.exp(logits - m)
    denom = jnp.sum(e, axis=-1, keepdims=True)
    o_ref[...] = (e / denom).astype(o_ref.dtype)


def _vmem_capacity_bytes():
    """Per-core VMEM capacity; conservative 64 MiB fallback (v7x per-TC size)."""
    try:
        return int(pltpu.get_tpu_info().vmem_capacity_bytes)
    except Exception:  # query unavailable (older runtime / interpret mode)
        return 64 * 1024 * 1024


def _pick_batch_tile(batch, f, o_pad, budget_bytes):
    """Largest batch tile whose double-buffered streams fit the per-core budget."""
    per_row = 2 * f * 4 + 2 * o_pad * 4                 # db f32 x-in + db f32 probs-out
    resident = 2 * f * o_pad * 4 + 2 * 8 * o_pad * 4    # weight + bias (double-buffered)
    avail = max(budget_bytes - resident, per_row * 8)
    tb = (avail // per_row // 8) * 8
    tb = max(8, min(2048, tb))                          # amortize ~0.35us per-step cost
    b8 = _round_up(max(batch, 1), 8)
    # Keep >= 2 grid steps when the batch allows so the "parallel" axis can be split
    # across the two TensorCores on v7x (a single-step grid idles one TC).
    if b8 >= 16:
        tb = min(tb, _round_up((b8 + 1) // 2, 8))
    return min(tb, b8)


def net_forward(x, weight, bias):
    """softmax(x @ weight.T + bias, axis=-1) — PyTorch `Net.forward` equivalent."""
    B, F = x.shape
    O, F2 = weight.shape
    assert F == F2, "weight must be (n_output, n_feature)"

    Op = _round_up(O, 128)                  # lane-dense class dim (unmasked stores)
    vmem_cap = _vmem_capacity_bytes()
    budget = vmem_cap * 3 // 4              # ~96 MiB on v5e/v6e, ~48 MiB per TC on v7x
    TB = _pick_batch_tile(B, F, Op, budget)
    Bp = _round_up(B, TB)

    # x keeps its original f32 layout; only the batch dim is padded when needed, so the
    # kernel reads f32 straight from HBM (no wrapper pad/cast pass over the features).
    x_f = jnp.asarray(x, jnp.float32)
    x_p = x_f if Bp == B else jnp.zeros((Bp, F), jnp.float32).at[:B, :].set(x_f)

    # Weight pre-transposed once to (F, Op); padded class columns are zero.  The bias
    # carries the class mask: padded logits == -1e30 -> exp underflows to exactly 0.
    w_p = jnp.zeros((F, Op), jnp.float32).at[:, :O].set(
        jnp.asarray(weight, jnp.float32).T)
    b_p = jnp.full((1, Op), _NEG_BIG, jnp.float32).at[0, :O].set(
        jnp.asarray(bias, jnp.float32))

    # Per-step VMEM footprint (double-buffered streams + resident params), with headroom.
    vmem_bytes = (2 * TB * F * 4 + 2 * TB * Op * 4
                  + 2 * F * Op * 4 + 2 * 8 * Op * 4)
    vmem_limit = int(min(max(2 * vmem_bytes, 4 * 1024 * 1024), vmem_cap))

    out = pl.pallas_call(
        _net_kernel,
        out_shape=jax.ShapeDtypeStruct((Bp, Op), jnp.float32),
        grid=(Bp // TB,),
        in_specs=[
            pl.BlockSpec((TB, F), lambda i: (i, 0)),   # x: streamed per batch tile
            pl.BlockSpec((F, Op), lambda i: (0, 0)),   # weight: resident, copied once
            pl.BlockSpec((1, Op), lambda i: (0, 0)),   # bias:   resident, copied once
        ],
        out_specs=pl.BlockSpec((TB, Op), lambda i: (i, 0)),
        compiler_params=pltpu.CompilerParams(
            dimension_semantics=("parallel",),
            vmem_limit_bytes=vmem_limit,
        ),
        cost_estimate=pl.CostEstimate(
            flops=2 * Bp * F * Op,
            transcendentals=Bp * Op,
            bytes_accessed=Bp * F * 4 + F * Op * 4 + Op * 4 + Bp * Op * 4,
        ),
    )(x_p, w_p, b_p)

    # Strip batch/class padding; skipped entirely when nothing was padded.
    if Bp == B and Op == O:
        return out
    return out[:B, :O]


if __name__ == "__main__":
    # Small shapes consistent with the module: n_feature=32, n_output=16, batch=8.
    B, n_feature, n_output = 8, 32, 16

    key = jax.random.PRNGKey(0)
    kx, kw, kb = jax.random.split(key, 3)

    x = jax.random.normal(kx, (B, n_feature), dtype=jnp.float32)
    bound = 1.0 / (n_feature ** 0.5)
    weight = jax.random.uniform(kw, (n_output, n_feature), minval=-bound, maxval=bound,
                                dtype=jnp.float32)
    bias = jax.random.uniform(kb, (n_output,), minval=-bound, maxval=bound,
                              dtype=jnp.float32)

    out = jax.block_until_ready(net_forward(x, weight, bias))

    # Reference check in plain JAX (f32 end-to-end, so tolerances are tight).
    ref = jax.nn.softmax(x @ weight.T + bias, axis=-1)
    assert out.shape == (B, n_output)
    assert jnp.allclose(out, ref, atol=1e-4, rtol=1e-4)
    assert jnp.allclose(jnp.sum(out, axis=-1), 1.0, atol=1e-5)

    print("KERNEL_OK")
</pallas_src>

<mosaic_0001>
module attributes {stable_mosaic.version = 11 : i64} {
  func.func @_net_kernel(%arg0: i32, %arg1: memref<8x32xf32, #tpu.memory_space<vmem>>, %arg2: memref<32x128xf32, #tpu.memory_space<vmem>>, %arg3: memref<1x128xf32, #tpu.memory_space<vmem>>, %arg4: memref<8x128xf32, #tpu.memory_space<vmem>>) attributes {dimension_semantics = [#tpu.dimension_semantics<parallel>], iteration_bounds = array<i64: 1>, scalar_prefetch = 0 : i64, scratch_operands = 0 : i64, tpu.core_type = #tpu.core_type<tc>, window_params = [{transform_indices = @transform_0, window_bounds = array<i64: 8, 32>}, {pipeline_mode = #tpu.pipeline_mode<synchronous>, transform_indices = @transform_1, window_bounds = array<i64: 32, 128>}, {pipeline_mode = #tpu.pipeline_mode<synchronous>, transform_indices = @transform_2, window_bounds = array<i64: 1, 128>}, {transform_indices = @transform_3, window_bounds = array<i64: 8, 128>}]} {
    %c0 = arith.constant 0 : index
    %c0_0 = arith.constant 0 : index
    %0 = vector.load %arg1[%c0, %c0_0] : memref<8x32xf32, #tpu.memory_space<vmem>>, vector<8x32xf32>
    %c0_1 = arith.constant 0 : index
    %c0_2 = arith.constant 0 : index
    %1 = vector.load %arg2[%c0_1, %c0_2] : memref<32x128xf32, #tpu.memory_space<vmem>>, vector<32x128xf32>
    %c0_3 = arith.constant 0 : index
    %c0_4 = arith.constant 0 : index
    %2 = vector.load %arg3[%c0_3, %c0_4] : memref<1x128xf32, #tpu.memory_space<vmem>>, vector<1x128xf32>
    %cst = arith.constant dense<0.000000e+00> : vector<8x128xf32>
    %3 = tpu.matmul %0, %1, %cst {dimension_numbers = #tpu.dot_dimension_numbers<[1], [0], [0], [1], [0, 0, 1, 1], [], []>} : vector<8x32xf32>, vector<32x128xf32>, vector<8x128xf32> -> vector<8x128xf32>
    %4 = vector.broadcast %2 : vector<1x128xf32> to vector<8x128xf32>
    %5 = arith.addf %3, %4 : vector<8x128xf32>
    %cst_5 = arith.constant dense<0xFF800000> : vector<8xf32>
    %6 = vector.multi_reduction <maximumf>, %5, %cst_5 [1] : vector<8x128xf32> to vector<8xf32>
    %7 = vector.shape_cast %6 : vector<8xf32> to vector<8x1xf32>
    %8 = vector.broadcast %7 : vector<8x1xf32> to vector<8x128xf32>
    %9 = arith.subf %5, %8 : vector<8x128xf32>
    %10 = math.exp %9 : vector<8x128xf32>
    %cst_6 = arith.constant dense<0.000000e+00> : vector<8xf32>
    %11 = vector.multi_reduction <add>, %10, %cst_6 [1] : vector<8x128xf32> to vector<8xf32>
    %12 = vector.shape_cast %11 : vector<8xf32> to vector<8x1xf32>
    %13 = vector.broadcast %12 : vector<8x1xf32> to vector<8x128xf32>
    %14 = arith.divf %10, %13 : vector<8x128xf32>
    %c0_7 = arith.constant 0 : index
    %c0_8 = arith.constant 0 : index
    %15 = vector.load %arg4[%c0_7, %c0_8] : memref<8x128xf32, #tpu.memory_space<vmem>>, vector<8x128xf32>
    tpu.vector_store %arg4[%c0_7, %c0_8], %14 {strides = array<i32>} : memref<8x128xf32, #tpu.memory_space<vmem>>, vector<8x128xf32>,
    return
  }
  func.func @transform_0(%arg0: i32) -> (i32, i32) {
    %c0_i32 = arith.constant 0 : i32
    %c0_i32_0 = arith.constant 0 : i32
    return %arg0, %c0_i32 : i32, i32
  }
  func.func @transform_1(%arg0: i32) -> (i32, i32) {
    %c0_i32 = arith.constant 0 : i32
    %c0_i32_0 = arith.constant 0 : i32
    %c0_i32_1 = arith.constant 0 : i32
    return %c0_i32, %c0_i32_0 : i32, i32
  }
  func.func @transform_2(%arg0: i32) -> (i32, i32) {
    %c0_i32 = arith.constant 0 : i32
    %c0_i32_0 = arith.constant 0 : i32
    %c0_i32_1 = arith.constant 0 : i32
    return %c0_i32, %c0_i32_0 : i32, i32
  }
  func.func @transform_3(%arg0: i32) -> (i32, i32) {
    %c0_i32 = arith.constant 0 : i32
    %c0_i32_0 = arith.constant 0 : i32
    return %arg0, %c0_i32 : i32, i32
  }
}

</mosaic_0001>

<bundles_post_ra>
// kernel: tpu_custom_call.1
= control target key start
LH: loop header
LB: loop body
LE: loop exit
PB: predicated region body
PF: predicated region fallthrough
CT: control target
= control target key end

     0   :  { %8 = vsyncpa [#allocation3], 0  ;;  %s245_s0 = inlined_call_operand.hbm [shape: f32[8,32], index: 0, kind: input, shape index: {}]   ;;  %s246_s1 = inlined_call_operand.hbm [shape: f32[32,128], index: 1, kind: input, shape index: {}]   ;;  %s247_s2 = inlined_call_operand.vmem [shape: f32[1,128], index: 2, kind: input, shape index: {}]   ;;  %s248_s3 = inlined_call_operand.hbm [shape: f32[8,128], index: 3, kind: output, shape index: {}]  }
   0x1   :  { %9 = vsyncpa [#allocation6], 0 }
   0x2   :  { %10 = vsyncpa [#allocation4], 0  ;;  %s16_s14 = sshll.u32 %s245_s0, 4  ;;  %s208_s15 = smov [#allocation2]   ;;  %s17_s14 = int_to_ptr.hbm [resolvable:$true] %s16_s14 }
   0x3   :  { %s18_s16 = sshll.u32 %s208_s15, 4  ;;  %s26_s19 = sshll.u32 %s246_s1, 4  ;;  %s19_s16 = int_to_ptr.vmem [resolvable:$true] %s18_s16  ;;  %s27_s19 = int_to_ptr.hbm [resolvable:$true] %s26_s19 }
   0x4   :  { %21 = dma.hbm_to_vmem [thread:$0]  %s17_s14, 128, %s19_s16, [#allocation3]  }
   0x5   :  { %s209_s20 = smov [#allocation5]   ;;  %s210_s22 = smov 128  }
   0x6   :  { %s28_s21 = sshll.u32 %s209_s20, 4  ;;  %s211_s23 = smov 8   ;;  %s29_s21 = int_to_ptr.vmem [resolvable:$true] %s28_s21 }
   0x7   :  { %34 = dma.hbm_to_vmem [thread:$0]  %s27_s19, 512, %s29_s21, [#allocation6], %s210_s22, %s210_s22, %s211_s23  }
   0x8   :  { %202 = dma.done.wait [#allocation3], 128  }
   0x9   :  { %203 = vsyncadd [#allocation3], 4294967168 }
   0xa   :  { %204 = dma.done.wait [#allocation6], 512  }
   0xb   :  { %205 = vsyncadd [#allocation6], 4294966784  ;;  %v49_v0 = vld [vmem:[#allocation5 + $0x18] sm:$0xff]  ;;  %v48_v1 = vld [vmem:[#allocation5 + $0x10] sm:$0xff]  ;;  %vm54_vm0 = vcmask 261120   ;;  %s108_s27 = sshll.u32 %s248_s3, 4  ;;  %s109_s27 = int_to_ptr.hbm [resolvable:$true] %s108_s27 }
   0xc   :  { %70 = vmatpush.msra.mxu0 %v49_v0  ;;  %v47_v2 = vld [vmem:[#allocation5 + $0x8] sm:$0xff]  ;;  %v46_v3 = vld [vmem:[#allocation5] sm:$0xff]  ;;  %v45_v4 = vld [vmem:[#allocation2] sm:$0xff] }
   0xd   :  { %v125_v5 = vld [vmem:[%s247_s2] ss:$0 sm:$0xff]  ;;  %s212_s2 = smov [#allocation7]  }
   0xe   :  { %71 = vmatpush.msra.mxu0 %v48_v1  ;;  %s106_s24 = sshll.u32 %s212_s2, 4  ;;  %s107_s24 = int_to_ptr.vmem [resolvable:$true] %s106_s24 }
  0x10   :  { %72 = vmatpush.msra.mxu0 %v47_v2 }
  0x12   :  { %73 = vmatpush.msra.mxu0 %v46_v3 }
  0x13   :  { %119 = vmatmul.msk.f32.vlgmr.msra.gmra.mxu0 %vm54_vm0, %v45_v4 }
  0x90   :  { %v75_v6 = vpop.f32.mrf.mxu0 }
  0x91   :  { %v76_v7 = vadd.f32 %v125_v5, %v75_v6 }
  0x93   :  { %78 = vmax.xlane.f32.xlu0 %v76_v7 }
 0x106   :  { %v79_v8 = vpop.xlane.xlu0 %78 }
 0x107   :  { %v80_v9 = vsub.f32 %v76_v7, %v79_v8 }
 0x109   :  { %v81_v10 = vmul.f32 1.442695, %v80_v9 }
 0x10b   :  { %126 = vpow2.f32 %v81_v10 }
 0x111   :  { %v127_v11 = vpop.eup %126 }
 0x112   :  { %83 = vadd.xlane.f32.xlu0 %v127_v11 }
 0x185   :  { %v84_v12 = vpop.xlane.xlu0 %83 }
 0x186   :  { %128 = vrcp.f32 %v84_v12  ;;  %v96_v16 = vand.u32 2147483648, %v84_v12  ;;  %v94_v18 = vand.u32 2147483647, %v84_v12  ;;  %vm90_vm2 = vweird.f32 %v84_v12 }
 0x188   :  { %v97_v20 = vor.u32 1.1754944e-38, %v96_v16  ;;  %vm95_vm4 = vcmp.eq.f32.partialorder %v94_v18, 8.507059e+37 }
 0x18c   :  { %v129_v13 = vpop.eup %128 }
 0x18d   :  { %v86_v14 = vmul.f32 %v129_v13, %v84_v12  ;;  %vm91_vm1 = vweird.f32 %v129_v13 }
 0x18e   :  { %vm92_vm3 = vmor %vm90_vm2, %vm91_vm1 }
 0x18f   :  { %v87_v15 = vsub.f32 1.0, %v86_v14 }
 0x191   :  { %v88_v17 = vmul.f32 %v129_v13, %v87_v15 }
 0x193   :  { %v89_v19 = vadd.f32 %v129_v13, %v88_v17 }
 0x195   :  { %v93_v21 = vsel %vm92_vm3, %v129_v13, %v89_v19 }
 0x196   :  { %v98_v22 = vsel %vm95_vm4, %v97_v20, %v93_v21 }
 0x197   :  { %v99_v23 = vmul.f32 %v127_v11, %v98_v22 }
 0x199   :  { %100 = vst [vmem:[#allocation7] sm:$0xff] %v99_v23 }
 0x19a   :  { %111 = dma.vmem_to_hbm [thread:$0]  %s107_s24, 128, %s109_s27, [#allocation4]  }
 0x19b   :  { %206 = dma.done.wait [#allocation4], 128  }
 0x19c   :  { %207 = vsyncadd [#allocation4], 4294967168 }
 0x19d   :  { %116 = vsyncpa [#allocation3], 1 }
 0x19e   :  { %117 = vsyncpa [#allocation6], 1 }
 0x19f   :  { %118 = vsyncpa [#allocation4], 1 }

</bundles_post_ra>
